<compile_context>
chip_gen: v7x
topology: tpu7x:2x2x1
jax: 0.10.0
libtpu: 0.0.40
codegen_flags: <defaults>
</compile_context>

<pallas_src>
import functools

import jax
import jax.numpy as jnp
from jax.experimental import pallas as pl
from jax.experimental.pallas import tpu as pltpu

H1, H2, H3 = 512, 256, 12
H3_PAD = 128  # lane-dense fc3 output width (sliced back to 12 outside)


def _round_up(a, b):
    return (a + b - 1) // b * b


def _mlp_kernel(x_ref, w1_ref, b1_ref, w2_ref, b2_ref, w3_ref, b3_ref,
                o_ref, *, dim_out):
    x_bf = x_ref[...]                        # (tm, D) bfloat16 (MXU operand)

    # ---- residual: first 512 features, or symmetric zero-pad to 512 ----
    # pad_left is 128-aligned for the D=256 case -> cheap lane-aligned concat;
    # non-128-aligned D stays correct but pays XLU lane shifts.
    if dim_out >= H1:
        resid = x_bf[:, :H1].astype(jnp.float32)
    else:
        pad_left = (H1 - dim_out) // 2
        pad_right = H1 - dim_out - pad_left
        zl = jnp.zeros((x_bf.shape[0], pad_left), dtype=x_bf.dtype)
        zr = jnp.zeros((x_bf.shape[0], pad_right), dtype=x_bf.dtype)
        resid = jnp.concatenate([zl, x_bf, zr], axis=-1).astype(jnp.float32)

    # ---- fc1 + relu + residual (bf16 operands, f32 accumulate) ----
    h1 = jnp.dot(x_bf, w1_ref[...],
                 preferred_element_type=jnp.float32) + b1_ref[...]
    h1 = resid + jnp.maximum(h1, 0.0)                   # (tm, 512) f32

    # ---- fc2 + relu + residual slice ----
    h2 = jnp.dot(h1.astype(jnp.bfloat16), w2_ref[...],
                 preferred_element_type=jnp.float32) + b2_ref[...]
    h2 = h1[:, :H2] + jnp.maximum(h2, 0.0)              # (tm, 256) f32

    # ---- fc3 (no relu), padded to 128 output lanes; cols 12..127 carry the
    #      h2 slab (w3/b3 pad columns are zero) and are sliced off outside ----
    h3 = jnp.dot(h2.astype(jnp.bfloat16), w3_ref[...],
                 preferred_element_type=jnp.float32) + b3_ref[...]
    o_ref[...] = (h2[:, :H3_PAD] + h3).astype(o_ref.dtype)   # (tm, 128) bf16


def prepare_params(params):
    """One-time conversion of the f32 Linear params to the kernel layout."""
    w1, b1, w2, b2, w3, b3 = params
    return (
        w1.astype(jnp.bfloat16), b1,
        w2.astype(jnp.bfloat16), b2,
        jnp.pad(w3, ((0, 0), (0, H3_PAD - H3))).astype(jnp.bfloat16),
        jnp.pad(b3, ((0, 0), (0, H3_PAD - H3))),
    )


def _pick_tm(M, D):
    if M <= 256:
        # single small tile: round rows up to the 8-sublane granule
        tm = _round_up(max(M, 8), 8)
    else:
        # >= 2 grid steps so both v7x TensorCores get work; 128-multiple; cap 512
        tm = min(512, _round_up(pl.cdiv(M, 2), 128))

    # Keep resident weights + tm-dependent VMEM (double-buffered bf16 x/out
    # blocks plus f32 temporaries) well under the default scoped budget so the
    # kernel also fits v7x's smaller VMEM.
    w_bytes = 2 * 2 * (D * H1 + H1 * H2 + H2 * H3_PAD)   # bf16, double-buffered

    def _tile_vmem(t):
        return (2 * t * D * 2            # x blocks, bf16, double-buffered
                + 2 * t * H3_PAD * 2     # out blocks, bf16, double-buffered
                + t * (2 * H1 + H2) * 4  # resid/h1/h2 f32 temporaries
                )

    while tm > 128 and w_bytes + _tile_vmem(tm) > (24 << 20):
        tm = max(128, _round_up(tm // 2, 8))
    return tm


def mlp_pallas(x, prepped_params):
    """x: (B, N, D).  prepped_params from prepare_params().
    Returns (B, N, 12) float32."""
    w1b, b1, w2b, b2, w3p, b3p = prepped_params
    B, N, D = x.shape
    M = B * N
    # Stream x as bf16 (in a full network this cast fuses with x's producer).
    x2 = x.reshape(M, D).astype(jnp.bfloat16)

    tm = _pick_tm(M, D)
    grid = (pl.cdiv(M, tm),)   # boundary block (if any) is masked by Pallas
    kernel = functools.partial(_mlp_kernel, dim_out=D)

    out2 = pl.pallas_call(
        kernel,
        out_shape=jax.ShapeDtypeStruct((M, H3_PAD), jnp.bfloat16),
        grid_spec=pltpu.PrefetchScalarGridSpec(
            num_scalar_prefetch=0,
            grid=grid,
            in_specs=[
                pl.BlockSpec((tm, D), lambda i: (i, 0)),        # x rows (bf16)
                pl.BlockSpec((D, H1), lambda i: (0, 0)),        # W1 (resident)
                pl.BlockSpec((1, H1), lambda i: (0, 0)),        # b1
                pl.BlockSpec((H1, H2), lambda i: (0, 0)),       # W2 (resident)
                pl.BlockSpec((1, H2), lambda i: (0, 0)),        # b2
                pl.BlockSpec((H2, H3_PAD), lambda i: (0, 0)),   # W3 padded
                pl.BlockSpec((1, H3_PAD), lambda i: (0, 0)),    # b3 padded
            ],
            out_specs=pl.BlockSpec((tm, H3_PAD), lambda i: (i, 0)),
        ),
        compiler_params=pltpu.CompilerParams(
            dimension_semantics=("parallel",)),
    )(x2, w1b, b1, w2b, b2, w3p, b3p)

    # Slice the 12 useful lanes and upcast; fuses into one short pass under jit.
    return out2[:, :H3].astype(jnp.float32).reshape(B, N, H3)


def mlp_reference(x, params):
    """Pure-JAX f32 reference mirroring the PyTorch forward."""
    w1, b1, w2, b2, w3, b3 = params
    D = x.shape[2]
    if D >= H1:
        resid = x[:, :, :H1]
    else:
        pad_left = (H1 - D) // 2
        pad_right = H1 - D - pad_left
        resid = jnp.pad(x, ((0, 0), (0, 0), (pad_left, pad_right)))
    h = resid + jax.nn.relu(x @ w1 + b1[0])
    h = h[:, :, :H2] + jax.nn.relu(h @ w2 + b2[0])
    h = h[:, :, :H3] + (h @ w3 + b3[0])
    return h


def init_params(key, dim_out):
    """Deterministic init; Linear weights stored pre-transposed as (in, out)."""
    ks = jax.random.split(key, 6)

    def lin(kw, kb, fan_in, fan_out):
        bound = 1.0 / jnp.sqrt(fan_in)
        w = jax.random.uniform(kw, (fan_in, fan_out), jnp.float32, -bound, bound)
        b = jax.random.uniform(kb, (1, fan_out), jnp.float32, -bound, bound)
        return w, b

    w1, b1 = lin(ks[0], ks[1], dim_out, H1)
    w2, b2 = lin(ks[2], ks[3], H1, H2)
    w3, b3 = lin(ks[4], ks[5], H2, H3)
    return (w1, b1, w2, b2, w3, b3)


if __name__ == "__main__":
    key = jax.random.PRNGKey(0)
    k_x, k_p = jax.random.split(key)

    B, N, DIM_OUT = 2, 8, 256  # dim_out = 256 (< 512 -> symmetric zero-pad path)
    x = jax.random.normal(k_x, (B, N, DIM_OUT), dtype=jnp.float32)
    params = init_params(k_p, DIM_OUT)
    prepped = prepare_params(params)   # one-time weight cast / pad

    fwd = jax.jit(mlp_pallas)
    out = jax.block_until_ready(fwd(x, prepped))

    ref = mlp_reference(x, params)
    assert out.shape == (B, N, H3)
    # bf16 streamed x / matmul operands / output with f32 accumulation
    # -> relaxed tolerance vs the pure-f32 reference.
    assert jnp.allclose(out, ref, atol=5e-2, rtol=5e-2)

    print("KERNEL_OK")
</pallas_src>

<mosaic_0001>
module attributes {stable_mosaic.version = 11 : i64} {
  func.func @_mlp_kernel(%arg0: i32, %arg1: memref<16x256xbf16, #tpu.memory_space<vmem>>, %arg2: memref<256x512xbf16, #tpu.memory_space<vmem>>, %arg3: memref<1x512xf32, #tpu.memory_space<vmem>>, %arg4: memref<512x256xbf16, #tpu.memory_space<vmem>>, %arg5: memref<1x256xf32, #tpu.memory_space<vmem>>, %arg6: memref<256x128xbf16, #tpu.memory_space<vmem>>, %arg7: memref<1x128xf32, #tpu.memory_space<vmem>>, %arg8: memref<16x128xbf16, #tpu.memory_space<vmem>>) attributes {dimension_semantics = [#tpu.dimension_semantics<parallel>], iteration_bounds = array<i64: 1>, scalar_prefetch = 0 : i64, scratch_operands = 0 : i64, tpu.core_type = #tpu.core_type<tc>, window_params = [{transform_indices = @transform_0, window_bounds = array<i64: 16, 256>}, {pipeline_mode = #tpu.pipeline_mode<synchronous>, transform_indices = @transform_1, window_bounds = array<i64: 256, 512>}, {pipeline_mode = #tpu.pipeline_mode<synchronous>, transform_indices = @transform_2, window_bounds = array<i64: 1, 512>}, {pipeline_mode = #tpu.pipeline_mode<synchronous>, transform_indices = @transform_3, window_bounds = array<i64: 512, 256>}, {pipeline_mode = #tpu.pipeline_mode<synchronous>, transform_indices = @transform_4, window_bounds = array<i64: 1, 256>}, {pipeline_mode = #tpu.pipeline_mode<synchronous>, transform_indices = @transform_5, window_bounds = array<i64: 256, 128>}, {pipeline_mode = #tpu.pipeline_mode<synchronous>, transform_indices = @transform_6, window_bounds = array<i64: 1, 128>}, {transform_indices = @transform_7, window_bounds = array<i64: 16, 128>}]} {
    %c0 = arith.constant 0 : index
    %c0_0 = arith.constant 0 : index
    %0 = vector.load %arg1[%c0, %c0_0] : memref<16x256xbf16, #tpu.memory_space<vmem>>, vector<16x256xbf16>
    %cst = arith.constant 0.000000e+00 : bf16
    %1 = vector.broadcast %cst : bf16 to vector<16x128xbf16>
    %cst_1 = arith.constant 0.000000e+00 : bf16
    %2 = vector.broadcast %cst_1 : bf16 to vector<16x128xbf16>
    %3 = tpu.concatenate %1, %0, %2 in 1 : vector<16x128xbf16>, vector<16x256xbf16>, vector<16x128xbf16> -> vector<16x512xbf16>
    %4 = arith.extf %3 : vector<16x512xbf16> to vector<16x512xf32>
    %c0_2 = arith.constant 0 : index
    %c0_3 = arith.constant 0 : index
    %5 = vector.load %arg2[%c0_2, %c0_3] : memref<256x512xbf16, #tpu.memory_space<vmem>>, vector<256x512xbf16>
    %cst_4 = arith.constant dense<0.000000e+00> : vector<16x512xf32>
    %6 = tpu.matmul %0, %5, %cst_4 {dimension_numbers = #tpu.dot_dimension_numbers<[1], [0], [0], [1], [0, 0, 1, 1], [], []>} : vector<16x256xbf16>, vector<256x512xbf16>, vector<16x512xf32> -> vector<16x512xf32>
    %c0_5 = arith.constant 0 : index
    %c0_6 = arith.constant 0 : index
    %7 = vector.load %arg3[%c0_5, %c0_6] : memref<1x512xf32, #tpu.memory_space<vmem>>, vector<1x512xf32>
    %8 = vector.broadcast %7 : vector<1x512xf32> to vector<16x512xf32>
    %9 = arith.addf %6, %8 : vector<16x512xf32>
    %cst_7 = arith.constant 0.000000e+00 : f32
    %10 = vector.broadcast %cst_7 : f32 to vector<16x512xf32>
    %11 = arith.maximumf %9, %10 : vector<16x512xf32>
    %12 = arith.addf %4, %11 : vector<16x512xf32>
    %13 = arith.truncf %12 : vector<16x512xf32> to vector<16x512xbf16>
    %c0_8 = arith.constant 0 : index
    %c0_9 = arith.constant 0 : index
    %14 = vector.load %arg4[%c0_8, %c0_9] : memref<512x256xbf16, #tpu.memory_space<vmem>>, vector<512x256xbf16>
    %cst_10 = arith.constant dense<0.000000e+00> : vector<16x256xf32>
    %15 = tpu.matmul %13, %14, %cst_10 {dimension_numbers = #tpu.dot_dimension_numbers<[1], [0], [0], [1], [0, 0, 1, 1], [], []>} : vector<16x512xbf16>, vector<512x256xbf16>, vector<16x256xf32> -> vector<16x256xf32>
    %c0_11 = arith.constant 0 : index
    %c0_12 = arith.constant 0 : index
    %16 = vector.load %arg5[%c0_11, %c0_12] : memref<1x256xf32, #tpu.memory_space<vmem>>, vector<1x256xf32>
    %17 = vector.broadcast %16 : vector<1x256xf32> to vector<16x256xf32>
    %18 = arith.addf %15, %17 : vector<16x256xf32>
    %19 = vector.extract_strided_slice %12 {offsets = [0, 0], sizes = [16, 256], strides = [1, 1]} : vector<16x512xf32> to vector<16x256xf32>
    %cst_13 = arith.constant 0.000000e+00 : f32
    %20 = vector.broadcast %cst_13 : f32 to vector<16x256xf32>
    %21 = arith.maximumf %18, %20 : vector<16x256xf32>
    %22 = arith.addf %19, %21 : vector<16x256xf32>
    %23 = arith.truncf %22 : vector<16x256xf32> to vector<16x256xbf16>
    %c0_14 = arith.constant 0 : index
    %c0_15 = arith.constant 0 : index
    %24 = vector.load %arg6[%c0_14, %c0_15] : memref<256x128xbf16, #tpu.memory_space<vmem>>, vector<256x128xbf16>
    %cst_16 = arith.constant dense<0.000000e+00> : vector<16x128xf32>
    %25 = tpu.matmul %23, %24, %cst_16 {dimension_numbers = #tpu.dot_dimension_numbers<[1], [0], [0], [1], [0, 0, 1, 1], [], []>} : vector<16x256xbf16>, vector<256x128xbf16>, vector<16x128xf32> -> vector<16x128xf32>
    %c0_17 = arith.constant 0 : index
    %c0_18 = arith.constant 0 : index
    %26 = vector.load %arg7[%c0_17, %c0_18] : memref<1x128xf32, #tpu.memory_space<vmem>>, vector<1x128xf32>
    %27 = vector.broadcast %26 : vector<1x128xf32> to vector<16x128xf32>
    %28 = arith.addf %25, %27 : vector<16x128xf32>
    %29 = vector.extract_strided_slice %22 {offsets = [0, 0], sizes = [16, 128], strides = [1, 1]} : vector<16x256xf32> to vector<16x128xf32>
    %30 = arith.addf %29, %28 : vector<16x128xf32>
    %31 = arith.truncf %30 : vector<16x128xf32> to vector<16x128xbf16>
    %c0_19 = arith.constant 0 : index
    %c0_20 = arith.constant 0 : index
    %32 = vector.load %arg8[%c0_19, %c0_20] : memref<16x128xbf16, #tpu.memory_space<vmem>>, vector<16x128xbf16>
    tpu.vector_store %arg8[%c0_19, %c0_20], %31 {strides = array<i32>} : memref<16x128xbf16, #tpu.memory_space<vmem>>, vector<16x128xbf16>,
    return
  }
  func.func @transform_0(%arg0: i32) -> (i32, i32) {
    %c0_i32 = arith.constant 0 : i32
    %c0_i32_0 = arith.constant 0 : i32
    return %arg0, %c0_i32 : i32, i32
  }
  func.func @transform_1(%arg0: i32) -> (i32, i32) {
    %c0_i32 = arith.constant 0 : i32
    %c0_i32_0 = arith.constant 0 : i32
    %c0_i32_1 = arith.constant 0 : i32
    return %c0_i32, %c0_i32_0 : i32, i32
  }
  func.func @transform_2(%arg0: i32) -> (i32, i32) {
    %c0_i32 = arith.constant 0 : i32
    %c0_i32_0 = arith.constant 0 : i32
    %c0_i32_1 = arith.constant 0 : i32
    return %c0_i32, %c0_i32_0 : i32, i32
  }
  func.func @transform_3(%arg0: i32) -> (i32, i32) {
    %c0_i32 = arith.constant 0 : i32
    %c0_i32_0 = arith.constant 0 : i32
    %c0_i32_1 = arith.constant 0 : i32
    return %c0_i32, %c0_i32_0 : i32, i32
  }
  func.func @transform_4(%arg0: i32) -> (i32, i32) {
    %c0_i32 = arith.constant 0 : i32
    %c0_i32_0 = arith.constant 0 : i32
    %c0_i32_1 = arith.constant 0 : i32
    return %c0_i32, %c0_i32_0 : i32, i32
  }
  func.func @transform_5(%arg0: i32) -> (i32, i32) {
    %c0_i32 = arith.constant 0 : i32
    %c0_i32_0 = arith.constant 0 : i32
    %c0_i32_1 = arith.constant 0 : i32
    return %c0_i32, %c0_i32_0 : i32, i32
  }
  func.func @transform_6(%arg0: i32) -> (i32, i32) {
    %c0_i32 = arith.constant 0 : i32
    %c0_i32_0 = arith.constant 0 : i32
    %c0_i32_1 = arith.constant 0 : i32
    return %c0_i32, %c0_i32_0 : i32, i32
  }
  func.func @transform_7(%arg0: i32) -> (i32, i32) {
    %c0_i32 = arith.constant 0 : i32
    %c0_i32_0 = arith.constant 0 : i32
    return %arg0, %c0_i32 : i32, i32
  }
}

</mosaic_0001>

<bundles_post_ra>
// kernel: mlp_pallas.1
= control target key start
LH: loop header
LB: loop body
LE: loop exit
PB: predicated region body
PF: predicated region fallthrough
CT: control target
= control target key end

     0   :  { %12 = vsyncpa [#allocation3], 0  ;;  %s1921_s0 = inlined_call_operand.vmem [shape: bf16[16,256], index: 0, kind: input, shape index: {}]   ;;  %s1922_s1 = inlined_call_operand.hbm [shape: bf16[256,512], index: 1, kind: input, shape index: {}]   ;;  %s1923_s2 = inlined_call_operand.vmem [shape: f32[1,512], index: 2, kind: input, shape index: {}]   ;;  %s1924_s3 = inlined_call_operand.hbm [shape: bf16[512,256], index: 3, kind: input, shape index: {}]   ;;  %s1925_s4 = inlined_call_operand.vmem [shape: f32[1,256], index: 4, kind: input, shape index: {}]   ;;  %s1926_s5 = inlined_call_operand.hbm [shape: bf16[256,128], index: 5, kind: input, shape index: {}]   ;;  %s1927_s6 = inlined_call_operand.vmem [shape: f32[1,128], index: 6, kind: input, shape index: {}]   ;;  %s1928_s7 = inlined_call_operand.vmem [shape: bf16[16,128], index: 7, kind: output, shape index: {}]  }
   0x1   :  { %13 = vsyncpa [#allocation5], 0  ;;  %s1761_s24 = smov [#allocation4]   ;;  %s1691_s28 = scalar_lea.hbm %s1924_s3, 8192 }
   0x2   :  { %s35_s25 = sshll.u32 %s1761_s24, 4  ;;  %p1692_p0 = scmp.ne.s32.totalorder %s1924_s3, %s1691_s28  ;;  %s36_s25 = int_to_ptr.vmem [resolvable:$true] %s35_s25 }
   0x3   :  { %p1695_p1 = scmp.lt.u32.totalorder %s1691_s28, %s1924_s3 }
   0x5   :  { %p1697_p2 = pnand %p1695_p1, %p1692_p0 }
   0x7   :  { %1700 = shalt.err (!%p1697_p2)
}
   0x8   :  { %s1701_s10 = scalar_lea.vmem %s36_s25, 8192  ;;  %p1706_p4 = scmp.lt.s32.totalorder %s36_s25, %s36_s25 }
   0x9   :  { %p1702_p3 = scmp.ne.s32.totalorder %s36_s25, %s1701_s10  ;;  %p1707_p5 = scmp.lt.s32.totalorder %s1701_s10, %s1701_s10 }
   0xb   :  { %p1708_p6 = por %p1707_p5, %p1706_p4 }
   0xd   :  { %p1709_p7 = pnand %p1708_p6, %p1702_p3 }
   0xf   :  { %1712 = shalt.err (!%p1709_p7)
}
  0x10   :  { %s1762_s11 = smov 128   ;;  %s1763_s12 = smov 8  }
  0x11   :  { %41 = dma.hbm_to_vmem [thread:$0]  %s1924_s3, 8192, %s36_s25, [#allocation5], %s1762_s11, %s1762_s11, %s1763_s12  }
  0x12   :  { %s1764_s15 = smov [#allocation2]   ;;  %s1713_s19 = scalar_lea.hbm %s1922_s1, 8192 }
  0x13   :  { %s21_s16 = sshll.u32 %s1764_s15, 4  ;;  %p1714_p8 = scmp.ne.s32.totalorder %s1922_s1, %s1713_s19  ;;  %s22_s16 = int_to_ptr.vmem [resolvable:$true] %s21_s16 }
  0x14   :  { %p1717_p9 = scmp.lt.u32.totalorder %s1713_s19, %s1922_s1 }
  0x16   :  { %p1719_p10 = pnand %p1717_p9, %p1714_p8 }
  0x18   :  { %1722 = shalt.err (!%p1719_p10)
}
  0x19   :  { %s1723_s24 = scalar_lea.vmem %s22_s16, 8192  ;;  %p1728_p12 = scmp.lt.s32.totalorder %s22_s16, %s22_s16 }
  0x1a   :  { %p1724_p11 = scmp.ne.s32.totalorder %s22_s16, %s1723_s24  ;;  %p1729_p13 = scmp.lt.s32.totalorder %s1723_s24, %s1723_s24 }
  0x1c   :  { %p1730_p0 = por %p1729_p13, %p1728_p12 }
  0x1e   :  { %p1731_p1 = pnand %p1730_p0, %p1724_p11 }
  0x20   :  { %1734 = shalt.err (!%p1731_p1)
}
  0x21   :  { %s1765_s3 = smov 256   ;;  %s1766_s25 = smov 16  }
  0x22   :  { %27 = dma.hbm_to_vmem [thread:$0]  %s1922_s1, 8192, %s22_s16, [#allocation3], %s1765_s3, %s1765_s3, %s1766_s25  }
  0x23   :  { %s1767_s28 = smov [#allocation6]   ;;  %s1735_s9 = scalar_lea.hbm %s1926_s5, 2048 }
  0x24   :  { %s49_s29 = sshll.u32 %s1767_s28, 4  ;;  %p1736_p2 = scmp.ne.s32.totalorder %s1926_s5, %s1735_s9  ;;  %s50_s29 = int_to_ptr.vmem [resolvable:$true] %s49_s29 }
  0x25   :  { %p1739_p3 = scmp.lt.u32.totalorder %s1735_s9, %s1926_s5 }
  0x27   :  { %p1741_p4 = pnand %p1739_p3, %p1736_p2 }
  0x29   :  { %1744 = shalt.err (!%p1741_p4)
}
  0x2a   :  { %s1745_s14 = scalar_lea.vmem %s50_s29, 2048  ;;  %p1750_p6 = scmp.lt.s32.totalorder %s50_s29, %s50_s29 }
  0x2b   :  { %p1746_p5 = scmp.ne.s32.totalorder %s50_s29, %s1745_s14  ;;  %p1751_p7 = scmp.lt.s32.totalorder %s1745_s14, %s1745_s14 }
  0x2d   :  { %p1752_p8 = por %p1751_p7, %p1750_p6 }
  0x2f   :  { %p1753_p9 = pnand %p1752_p8, %p1746_p5 }
  0x31   :  { %1756 = shalt.err (!%p1753_p9)
}
  0x32   :  { %s1768_s1 = smov 64   ;;  %s1769_s15 = smov 4  }
  0x33   :  { %55 = dma.hbm_to_vmem [thread:$0]  %s1926_s5, 2048, %s50_s29, [#allocation5], %s1768_s1, %s1768_s1, %s1769_s15  }
  0x34   :  { %1757 = dma.done.wait [#allocation3], 8192  }
  0x35   :  { %1758 = vsyncadd [#allocation3], 4294959104 }
  0x36   :  { %1759 = dma.done.wait [#allocation5], 10240  }
  0x37   :  { %1760 = vsyncadd [#allocation5], 4294957056  ;;  %v1480_v0 = vld [vmem:[#allocation2 + $0x4] ss:$16 sps:$4 sm:$0xff]   ;;  %v1482_v1 = vld [vmem:[#allocation2] ss:$16 sps:$4 sm:$0xff]  }
  0x38   :  { %492 = vmatprep.subr.bf16.mxu1 %v1480_v0  ;;  %v1483_v2 = vld [vmem:[#allocation2 + $0x24] ss:$16 sps:$4 sm:$0xff]   ;;  %v1485_v3 = vld [vmem:[#allocation2 + $0x20] ss:$16 sps:$4 sm:$0xff]   ;;  %v1533_v42 = vld [vmem:[#allocation2 + $0xc] ss:$16 sps:$4 sm:$0xff]  }
  0x39   :  { %493 = vmatpush1.bf16.msra.mxu1 %v1482_v1  ;;  %v1486_v4 = vld [vmem:[#allocation2 + $0x44] ss:$16 sps:$4 sm:$0xff]   ;;  %v1488_v5 = vld [vmem:[#allocation2 + $0x40] ss:$16 sps:$4 sm:$0xff]   ;;  %v1531_v46 = vld [vmem:[#allocation2 + $0x8] ss:$16 sps:$4 sm:$0xff]  }
  0x3a   :  { %494 = vmatprep.subr.bf16.mxu1 %v1483_v2  ;;  %v1489_v6 = vld [vmem:[#allocation2 + $0x64] ss:$16 sps:$4 sm:$0xff]   ;;  %v1491_v7 = vld [vmem:[#allocation2 + $0x60] ss:$16 sps:$4 sm:$0xff]   ;;  %v1536_v47 = vld [vmem:[#allocation2 + $0x2c] ss:$16 sps:$4 sm:$0xff]  }
  0x3b   :  { %v1492_v8 = vld [vmem:[#allocation2 + $0x84] ss:$16 sps:$4 sm:$0xff]   ;;  %v1494_v9 = vld [vmem:[#allocation2 + $0x80] ss:$16 sps:$4 sm:$0xff]   ;;  %v1534_v50 = vld [vmem:[#allocation2 + $0x28] ss:$16 sps:$4 sm:$0xff]  }
  0x3c   :  { %v1495_v10 = vld [vmem:[#allocation2 + $0xa4] ss:$16 sps:$4 sm:$0xff]   ;;  %v1497_v11 = vld [vmem:[#allocation2 + $0xa0] ss:$16 sps:$4 sm:$0xff]   ;;  %v1539_v51 = vld [vmem:[#allocation2 + $0x4c] ss:$16 sps:$4 sm:$0xff]  }
  0x3d   :  { %495 = vmatpush1.bf16.msra.mxu1 %v1485_v3  ;;  %v1498_v12 = vld [vmem:[#allocation2 + $0xc4] ss:$16 sps:$4 sm:$0xff]   ;;  %v1500_v14 = vld [vmem:[#allocation2 + $0xc0] ss:$16 sps:$4 sm:$0xff]   ;;  %v1537_v54 = vld [vmem:[#allocation2 + $0x48] ss:$16 sps:$4 sm:$0xff]  }
  0x3e   :  { %496 = vmatprep.subr.bf16.mxu1 %v1486_v4  ;;  %v1850_v13 = vld [vmem:[%s1921_s0 + $0x4] ss:$8 sps:$4 sm:$0xff]   ;;  %v1503_v16 = vld [vmem:[#allocation2 + $0xe0] ss:$16 sps:$4 sm:$0xff]   ;;  %v1582_v29 = vld [vmem:[#allocation4 + $0x14] ss:$8 sps:$4 sm:$0xff]  }
  0x3f   :  { %v1501_v15 = vld [vmem:[#allocation2 + $0xe4] ss:$16 sps:$4 sm:$0xff]   ;;  %524 = vmatprep.mubr.bf16.mxu1 %v1850_v13  ;;  %v1506_v18 = vld [vmem:[#allocation2 + $0x100] ss:$16 sps:$4 sm:$0xff]   ;;  %v1542_v55 = vld [vmem:[#allocation2 + $0x6c] ss:$16 sps:$4 sm:$0xff]  }
  0x40   :  { %v1504_v17 = vld [vmem:[#allocation2 + $0x104] ss:$16 sps:$4 sm:$0xff]   ;;  %v1509_v20 = vld [vmem:[#allocation2 + $0x120] ss:$16 sps:$4 sm:$0xff]   ;;  %v1540_v58 = vld [vmem:[#allocation2 + $0x68] ss:$16 sps:$4 sm:$0xff]  }
  0x41   :  { %497 = vmatpush1.bf16.msra.mxu1 %v1488_v5  ;;  %v1507_v19 = vld [vmem:[#allocation2 + $0x124] ss:$16 sps:$4 sm:$0xff]   ;;  %v1512_v22 = vld [vmem:[#allocation2 + $0x140] ss:$16 sps:$4 sm:$0xff]   ;;  %v1545_v59 = vld [vmem:[#allocation2 + $0x8c] ss:$16 sps:$4 sm:$0xff]  }
  0x42   :  { %498 = vmatprep.subr.bf16.mxu1 %v1489_v6  ;;  %v1510_v21 = vld [vmem:[#allocation2 + $0x144] ss:$16 sps:$4 sm:$0xff]   ;;  %v1515_v24 = vld [vmem:[#allocation2 + $0x160] ss:$16 sps:$4 sm:$0xff]   ;;  %v1543_v62 = vld [vmem:[#allocation2 + $0x88] ss:$16 sps:$4 sm:$0xff]  }
  0x43   :  { %v1513_v23 = vld [vmem:[#allocation2 + $0x164] ss:$16 sps:$4 sm:$0xff]   ;;  %v1581_v27 = vld [vmem:[#allocation4] ss:$8 sps:$4 sm:$0xff]   ;;  %v1584_v31 = vld [vmem:[#allocation4 + $0x10] ss:$8 sps:$4 sm:$0xff]  }
  0x44   :  { %v1516_v25 = vld [vmem:[#allocation2 + $0x184] ss:$16 sps:$4 sm:$0xff]   ;;  %v1518_v28 = vld [vmem:[#allocation2 + $0x180] ss:$16 sps:$4 sm:$0xff]   ;;  %v1548_v63 = vld [vmem:[#allocation2 + $0xac] ss:$16 sps:$4 sm:$0xff]  }
  0x45   :  { %499 = vmatpush1.bf16.msra.mxu1 %v1491_v7  ;;  %v1579_v26 = vld [vmem:[#allocation4 + $0x4] ss:$8 sps:$4 sm:$0xff]   ;;  %v1521_v33 = vld [vmem:[#allocation2 + $0x1a0] ss:$16 sps:$4 sm:$0xff]   ;;  %v1588_v36 = vld [vmem:[#allocation4 + $0x34] ss:$8 sps:$4 sm:$0xff]  }
  0x46   :  { %500 = vmatprep.subr.bf16.mxu1 %v1492_v8  ;;  %994 = vmatprep.subr.bf16.mxu0 %v1579_v26  ;;  %v1519_v30 = vld [vmem:[#allocation2 + $0x1a4] ss:$16 sps:$4 sm:$0xff]   ;;  %v1587_v35 = vld [vmem:[#allocation4 + $0x20] ss:$8 sps:$4 sm:$0xff]   ;;  %v1590_v39 = vld [vmem:[#allocation4 + $0x30] ss:$8 sps:$4 sm:$0xff]  }
  0x47   :  { %995 = vmatpush1.bf16.msra.mxu0 %v1581_v27  ;;  %v1585_v32 = vld [vmem:[#allocation4 + $0x24] ss:$8 sps:$4 sm:$0xff]   ;;  %v1524_v37 = vld [vmem:[#allocation2 + $0x1c0] ss:$16 sps:$4 sm:$0xff]   ;;  %v1594_v44 = vld [vmem:[#allocation4 + $0x54] ss:$8 sps:$4 sm:$0xff]  }
  0x48   :  { %996 = vmatprep.subr.bf16.mxu0 %v1582_v29  ;;  %v1522_v34 = vld [vmem:[#allocation2 + $0x1c4] ss:$16 sps:$4 sm:$0xff]   ;;  %v1527_v41 = vld [vmem:[#allocation2 + $0x1e0] ss:$16 sps:$4 sm:$0xff]   ;;  %v1546_v2 = vld [vmem:[#allocation2 + $0xa8] ss:$16 sps:$4 sm:$0xff]  }
  0x49   :  { %501 = vmatpush1.bf16.msra.mxu1 %v1494_v9  ;;  %v1525_v38 = vld [vmem:[#allocation2 + $0x1e4] ss:$16 sps:$4 sm:$0xff]   ;;  %v1593_v43 = vld [vmem:[#allocation4 + $0x40] ss:$8 sps:$4 sm:$0xff]   ;;  %v1596_v48 = vld [vmem:[#allocation4 + $0x50] ss:$8 sps:$4 sm:$0xff]  }
  0x4a   :  { %502 = vmatprep.subr.bf16.mxu1 %v1495_v10  ;;  %v1591_v40 = vld [vmem:[#allocation4 + $0x44] ss:$8 sps:$4 sm:$0xff]   ;;  %v1856_v45 = vld [vmem:[%s1921_s0] ss:$8 sps:$4 sm:$0xff]   ;;  %v1600_v53 = vld [vmem:[#allocation4 + $0x74] ss:$8 sps:$4 sm:$0xff]  }
  0x4b   :  { %997 = vmatpush1.bf16.msra.mxu0 %v1584_v31  ;;  %v1597_v49 = vld [vmem:[#allocation4 + $0x64] ss:$8 sps:$4 sm:$0xff]   ;;  %v1599_v52 = vld [vmem:[#allocation4 + $0x60] ss:$8 sps:$4 sm:$0xff]   ;;  %v1602_v56 = vld [vmem:[#allocation4 + $0x70] ss:$8 sps:$4 sm:$0xff]  }
  0x4c   :  { %998 = vmatprep.subr.bf16.mxu0 %v1585_v32  ;;  %v1603_v57 = vld [vmem:[#allocation4 + $0x84] ss:$8 sps:$4 sm:$0xff]   ;;  %v1605_v60 = vld [vmem:[#allocation4 + $0x80] ss:$8 sps:$4 sm:$0xff]   ;;  %v1606_v61 = vld [vmem:[#allocation4 + $0x94] ss:$8 sps:$4 sm:$0xff]  }
  0x4d   :  { %503 = vmatpush1.bf16.msra.mxu1 %v1497_v11  ;;  %v1608_v0 = vld [vmem:[#allocation4 + $0x90] ss:$8 sps:$4 sm:$0xff]   ;;  %v1609_v1 = vld [vmem:[#allocation4 + $0xa4] ss:$8 sps:$4 sm:$0xff]   ;;  %v1611_v4 = vld [vmem:[#allocation4 + $0xa0] ss:$8 sps:$4 sm:$0xff]  }
  0x4e   :  { %504 = vmatprep.subr.bf16.mxu1 %v1498_v12  ;;  %v1551_v3 = vld [vmem:[#allocation2 + $0xcc] ss:$16 sps:$4 sm:$0xff]   ;;  %v1549_v6 = vld [vmem:[#allocation2 + $0xc8] ss:$16 sps:$4 sm:$0xff]  }
  0x4f   :  { %999 = vmatpush1.bf16.msra.mxu0 %v1587_v35  ;;  %v1612_v5 = vld [vmem:[#allocation4 + $0xb4] ss:$8 sps:$4 sm:$0xff]   ;;  %v1614_v8 = vld [vmem:[#allocation4 + $0xb0] ss:$8 sps:$4 sm:$0xff]   ;;  %v1615_v9 = vld [vmem:[#allocation4 + $0xc4] ss:$8 sps:$4 sm:$0xff]  }
  0x50   :  { %1000 = vmatprep.subr.bf16.mxu0 %v1588_v36  ;;  %v1554_v7 = vld [vmem:[#allocation2 + $0xec] ss:$16 sps:$4 sm:$0xff]   ;;  %v1552_v10 = vld [vmem:[#allocation2 + $0xe8] ss:$16 sps:$4 sm:$0xff]   ;;  %v1675_v36 = vld [vmem:[#allocation6 + $0x40] sm:$0xff]  }
  0x51   :  { %505 = vmatpush1.bf16.msra.mxu1 %v1500_v14  ;;  %v1557_v11 = vld [vmem:[#allocation2 + $0x10c] ss:$16 sps:$4 sm:$0xff]   ;;  %v1617_v12 = vld [vmem:[#allocation4 + $0xc0] ss:$8 sps:$4 sm:$0xff]  }
  0x52   :  { %506 = vmatprep.subr.bf16.mxu1 %v1501_v15  ;;  %v1555_v14 = vld [vmem:[#allocation2 + $0x108] ss:$16 sps:$4 sm:$0xff]   ;;  %v1560_v15 = vld [vmem:[#allocation2 + $0x12c] ss:$16 sps:$4 sm:$0xff]  }
  0x53   :  { %1001 = vmatpush1.bf16.msra.mxu0 %v1590_v39  ;;  %v1573_v26 = vld [vmem:[#allocation2 + $0x1c8] ss:$16 sps:$4 sm:$0xff]   ;;  %v1578_v27 = vld [vmem:[#allocation2 + $0x1ec] ss:$16 sps:$4 sm:$0xff]  }
  0x54   :  { %1002 = vmatprep.subr.bf16.mxu0 %v1591_v40  ;;  %v1618_v29 = vld [vmem:[#allocation4 + $0xd4] ss:$8 sps:$4 sm:$0xff]   ;;  %v1621_v31 = vld [vmem:[#allocation4 + $0xe4] ss:$8 sps:$4 sm:$0xff]   ;;  %v1623_v32 = vld [vmem:[#allocation4 + $0xe0] ss:$8 sps:$4 sm:$0xff]  }
  0x55   :  { %507 = vmatpush1.bf16.msra.mxu1 %v1503_v16  ;;  %v1558_v16 = vld [vmem:[#allocation2 + $0x128] ss:$16 sps:$4 sm:$0xff]   ;;  %v1629_v35 = vld [vmem:[#allocation4 + $0x104] ss:$8 sps:$4 sm:$0xff]   ;;  %v1679_v40 = vld [vmem:[#allocation6 + $0x50] sm:$0xff]  }
  0x56   :  { %508 = vmatprep.subr.bf16.mxu1 %v1504_v17  ;;  %v1563_v17 = vld [vmem:[#allocation2 + $0x14c] ss:$16 sps:$4 sm:$0xff]  }
  0x57   :  { %1003 = vmatpush1.bf16.msra.mxu0 %v1593_v43  ;;  %v1678_v39 = vld [vmem:[#allocation6 + $0x8] sm:$0xff]   ;;  %v1682_v43 = vld [vmem:[#allocation6 + $0x18] sm:$0xff]  }
  0x58   :  { %1004 = vmatprep.subr.bf16.mxu0 %v1594_v44  ;;  %v1683_v44 = vld [vmem:[#allocation6 + $0x60] sm:$0xff]  }
  0x59   :  { %509 = vmatpush1.bf16.msra.mxu1 %v1506_v18  ;;  %v1561_v18 = vld [vmem:[#allocation2 + $0x148] ss:$16 sps:$4 sm:$0xff]  }
  0x5a   :  { %510 = vmatprep.subr.bf16.mxu1 %v1507_v19  ;;  %v1566_v19 = vld [vmem:[#allocation2 + $0x16c] ss:$16 sps:$4 sm:$0xff]  }
  0x5b   :  { %1005 = vmatpush1.bf16.msra.mxu0 %v1596_v48 }
  0x5c   :  { %1006 = vmatprep.subr.bf16.mxu0 %v1597_v49 }
  0x5d   :  { %511 = vmatpush1.bf16.msra.mxu1 %v1509_v20  ;;  %v1564_v20 = vld [vmem:[#allocation2 + $0x168] ss:$16 sps:$4 sm:$0xff]  }
  0x5e   :  { %512 = vmatprep.subr.bf16.mxu1 %v1510_v21  ;;  %v1569_v21 = vld [vmem:[#allocation2 + $0x18c] ss:$16 sps:$4 sm:$0xff]  }
  0x5f   :  { %1007 = vmatpush1.bf16.msra.mxu0 %v1599_v52 }
  0x60   :  { %1008 = vmatprep.subr.bf16.mxu0 %v1600_v53 }
  0x61   :  { %513 = vmatpush1.bf16.msra.mxu1 %v1512_v22  ;;  %v1567_v22 = vld [vmem:[#allocation2 + $0x188] ss:$16 sps:$4 sm:$0xff]  }
  0x62   :  { %514 = vmatprep.subr.bf16.mxu1 %v1513_v23  ;;  %v1572_v23 = vld [vmem:[#allocation2 + $0x1ac] ss:$16 sps:$4 sm:$0xff]  }
  0x63   :  { %1009 = vmatpush1.bf16.msra.mxu0 %v1602_v56 }
  0x64   :  { %1010 = vmatprep.subr.bf16.mxu0 %v1603_v57 }
  0x65   :  { %515 = vmatpush1.bf16.msra.mxu1 %v1515_v24  ;;  %v1570_v24 = vld [vmem:[#allocation2 + $0x1a8] ss:$16 sps:$4 sm:$0xff]  }
  0x66   :  { %516 = vmatprep.subr.bf16.mxu1 %v1516_v25  ;;  %v1575_v25 = vld [vmem:[#allocation2 + $0x1cc] ss:$16 sps:$4 sm:$0xff]  }
  0x67   :  { %1011 = vmatpush1.bf16.msra.mxu0 %v1605_v60 }
  0x68   :  { %1012 = vmatprep.subr.bf16.mxu0 %v1606_v61 }
  0x69   :  { %517 = vmatpush1.bf16.msra.mxu1 %v1518_v28  ;;  %v1576_v28 = vld [vmem:[#allocation2 + $0x1e8] ss:$16 sps:$4 sm:$0xff]  }
  0x6a   :  { %518 = vmatprep.subr.bf16.mxu1 %v1519_v30  ;;  %v1620_v30 = vld [vmem:[#allocation4 + $0xd0] ss:$8 sps:$4 sm:$0xff]  }
  0x6b   :  { %1013 = vmatpush1.bf16.msra.mxu0 %v1608_v0 }
  0x6c   :  { %1014 = vmatprep.subr.bf16.mxu0 %v1609_v1 }
  0x6d   :  { %519 = vmatpush1.bf16.msra.mxu1 %v1521_v33  ;;  %v1624_v33 = vld [vmem:[#allocation4 + $0xf4] ss:$8 sps:$4 sm:$0xff]  }
  0x6e   :  { %520 = vmatprep.subr.bf16.mxu1 %v1522_v34  ;;  %v1626_v34 = vld [vmem:[#allocation4 + $0xf0] ss:$8 sps:$4 sm:$0xff]  }
  0x6f   :  { %1015 = vmatpush1.bf16.msra.mxu0 %v1611_v4  ;;  %v84_v4 = vunpack.c.h.bf16 %v1856_v45 }
  0x70   :  { %1016 = vmatprep.subr.bf16.mxu0 %v1612_v5 }
  0x71   :  { %521 = vmatpush1.bf16.msra.mxu1 %v1524_v37  ;;  %v1676_v37 = vld [vmem:[#allocation6] sm:$0xff]  }
  0x72   :  { %522 = vmatprep.subr.bf16.mxu1 %v1525_v38  ;;  %v1677_v38 = vld [vmem:[#allocation6 + $0x48] sm:$0xff]  }
  0x73   :  { %1017 = vmatpush1.bf16.msra.mxu0 %v1614_v8 }
  0x74   :  { %1018 = vmatprep.subr.bf16.mxu0 %v1615_v9 }
  0x75   :  { %523 = vmatpush1.bf16.msra.mxu1 %v1527_v41  ;;  %v1680_v41 = vld [vmem:[#allocation6 + $0x10] sm:$0xff]  }
  0x76   :  { %535 = vmatprep.subr.bf16.mxu1 %v1533_v42  ;;  %v1681_v42 = vld [vmem:[#allocation6 + $0x58] sm:$0xff]  }
  0x77   :  { %1019 = vmatpush1.bf16.msra.mxu0 %v1617_v12  ;;  %v1627_v12 = vld [vmem:[#allocation4 + $0x100] ss:$8 sps:$4 sm:$0xff]  }
  0x78   :  { %525 = vmatmul.mubr.bf16.vlgmr.msra.gmra.mrb[0].mxu1 %v1856_v45  ;;  %1020 = vmatprep.subr.bf16.mxu0 %v1618_v29  ;;  %v1651_v29 = vld [vmem:[#allocation4 + $0x180] ss:$8 sps:$4 sm:$0xff]  }
  0x79   :  { %536 = vmatpush1.bf16.msra.mxu1 %v1531_v46  ;;  %567 = vmatprep.mubr.bf16.mxu1 %v1850_v13  ;;  %v1684_v46 = vld [vmem:[#allocation6 + $0x20] sm:$0xff]  }
  0x7a   :  { %537 = vmatprep.subr.bf16.mxu1 %v1536_v47  ;;  %v152_v47 = vlaneseq }
  0x7b   :  { %1021 = vmatpush1.bf16.msra.mxu0 %v1620_v30  ;;  %v1656_v30 = vld [vmem:[#allocation4 + $0x194] ss:$8 sps:$4 sm:$0xff]  }
  0x7c   :  { %1022 = vmatprep.subr.bf16.mxu0 %v1621_v31  ;;  %v1861_v48 = vshrl.u32 %v152_v47, 7  ;;  %v1654_v31 = vld [vmem:[#allocation4 + $0x190] ss:$8 sps:$4 sm:$0xff]  }
  0x7d   :  { %538 = vmatpush1.bf16.msra.mxu1 %v1534_v50  ;;  %v1867_v50 = vld [vmem:[%s1923_s2] sm:$0xf] }
  0x7e   :  { %539 = vmatprep.subr.bf16.mxu1 %v1539_v51  ;;  %v154_v49 = vsub.s32 0, %v1861_v48  ;;  %v158_v51 = vsub.s32 1, %v1861_v48 }
  0x7f   :  { %1023 = vmatpush1.bf16.msra.mxu0 %v1623_v32  ;;  %v1659_v32 = vld [vmem:[#allocation4 + $0x1a4] ss:$8 sps:$4 sm:$0xff]  }
  0x80   :  { %1024 = vmatprep.subr.bf16.mxu0 %v1624_v33  ;;  %v155_v52 = vrot.slane %v1867_v50, %v154_v49  ;;  %v159_v53 = vrot.slane %v1867_v50, %v158_v51  ;;  %v1657_v33 = vld [vmem:[#allocation4 + $0x1a0] ss:$8 sps:$4 sm:$0xff]  }
  0x81   :  { %540 = vmatpush1.bf16.msra.mxu1 %v1537_v54 }
  0x82   :  { %541 = vmatprep.subr.bf16.mxu1 %v1542_v55 }
  0x83   :  { %1025 = vmatpush1.bf16.msra.mxu0 %v1626_v34  ;;  %v1662_v34 = vld [vmem:[#allocation4 + $0x1b4] ss:$8 sps:$4 sm:$0xff]  }
  0x84   :  { %1037 = vmatprep.subr.bf16.mxu0 %v1629_v35  ;;  %v1660_v35 = vld [vmem:[#allocation4 + $0x1b0] ss:$8 sps:$4 sm:$0xff]  }
  0x85   :  { %542 = vmatpush1.bf16.msra.mxu1 %v1540_v58 }
  0x86   :  { %543 = vmatprep.subr.bf16.mxu1 %v1545_v59  ;;  %v1770_v59 = vmov 0  }
  0x87   :  { %v1876_v60 = vunpack.c.l.bf16 %v1770_v59 }
  0x89   :  { %544 = vmatpush1.bf16.msra.mxu1 %v1543_v62  ;;  %v1878_v62 = vunpack.c.h.bf16 %v1770_v59 }
  0x8a   :  { %545 = vmatprep.subr.bf16.mxu1 %v1548_v63 }
  0x8d   :  { %546 = vmatpush1.bf16.msra.mxu1 %v1546_v2 }
  0x8e   :  { %547 = vmatprep.subr.bf16.mxu1 %v1551_v3  ;;  %v81_v3 = vunpack.c.l.bf16 %v1856_v45 }
  0x91   :  { %548 = vmatpush1.bf16.msra.mxu1 %v1549_v6 }
  0x92   :  { %549 = vmatprep.subr.bf16.mxu1 %v1554_v7 }
  0x95   :  { %550 = vmatpush1.bf16.msra.mxu1 %v1552_v10 }
  0x96   :  { %551 = vmatprep.subr.bf16.mxu1 %v1557_v11 }
  0x99   :  { %552 = vmatpush1.bf16.msra.mxu1 %v1555_v14 }
  0x9a   :  { %553 = vmatprep.subr.bf16.mxu1 %v1560_v15  ;;  %v1630_v15 = vld [vmem:[#allocation4 + $0x110] ss:$8 sps:$4 sm:$0xff]  }
  0x9d   :  { %554 = vmatpush1.bf16.msra.mxu1 %v1558_v16  ;;  %v1635_v16 = vld [vmem:[#allocation4 + $0x124] ss:$8 sps:$4 sm:$0xff]  }
  0x9e   :  { %555 = vmatprep.subr.bf16.mxu1 %v1563_v17  ;;  %v1633_v17 = vld [vmem:[#allocation4 + $0x120] ss:$8 sps:$4 sm:$0xff]  }
  0xa1   :  { %556 = vmatpush1.bf16.msra.mxu1 %v1561_v18  ;;  %v1638_v18 = vld [vmem:[#allocation4 + $0x134] ss:$8 sps:$4 sm:$0xff]  }
  0xa2   :  { %557 = vmatprep.subr.bf16.mxu1 %v1566_v19  ;;  %v1636_v19 = vld [vmem:[#allocation4 + $0x130] ss:$8 sps:$4 sm:$0xff]  }
  0xa5   :  { %558 = vmatpush1.bf16.msra.mxu1 %v1564_v20  ;;  %v1641_v20 = vld [vmem:[#allocation4 + $0x144] ss:$8 sps:$4 sm:$0xff]  }
  0xa6   :  { %559 = vmatprep.subr.bf16.mxu1 %v1569_v21  ;;  %v1639_v21 = vld [vmem:[#allocation4 + $0x140] ss:$8 sps:$4 sm:$0xff]  }
  0xa9   :  { %560 = vmatpush1.bf16.msra.mxu1 %v1567_v22  ;;  %v1644_v22 = vld [vmem:[#allocation4 + $0x154] ss:$8 sps:$4 sm:$0xff]  }
  0xaa   :  { %561 = vmatprep.subr.bf16.mxu1 %v1572_v23  ;;  %v1642_v23 = vld [vmem:[#allocation4 + $0x150] ss:$8 sps:$4 sm:$0xff]  }
  0xad   :  { %562 = vmatpush1.bf16.msra.mxu1 %v1570_v24  ;;  %v1647_v24 = vld [vmem:[#allocation4 + $0x164] ss:$8 sps:$4 sm:$0xff]  }
  0xae   :  { %563 = vmatprep.subr.bf16.mxu1 %v1575_v25  ;;  %v1645_v25 = vld [vmem:[#allocation4 + $0x160] ss:$8 sps:$4 sm:$0xff]  }
  0xb1   :  { %564 = vmatpush1.bf16.msra.mxu1 %v1573_v26  ;;  %v1650_v26 = vld [vmem:[#allocation4 + $0x174] ss:$8 sps:$4 sm:$0xff]  }
  0xb2   :  { %565 = vmatprep.subr.bf16.mxu1 %v1578_v27  ;;  %v1648_v27 = vld [vmem:[#allocation4 + $0x170] ss:$8 sps:$4 sm:$0xff]  }
  0xb5   :  { %566 = vmatpush1.bf16.msra.mxu1 %v1576_v28  ;;  %v1653_v28 = vld [vmem:[#allocation4 + $0x184] ss:$8 sps:$4 sm:$0xff]  }
  0xb6   :  { %1440 = vmatprep.subr.bf16.mxu1 %v1675_v36  ;;  %v1665_v36 = vld [vmem:[#allocation4 + $0x1c4] ss:$8 sps:$4 sm:$0xff]  }
  0xb8   :  { %568 = vmatmul.mubr.bf16.vlgmr.msra.gmra.mrb[4].mxu1 %v1856_v45  ;;  %v1632_v45 = vld [vmem:[#allocation4 + $0x114] ss:$8 sps:$4 sm:$0xff]  }
  0xb9   :  { %1441 = vmatpush3.bf16.msra.mxu1 %v1676_v37  ;;  %v162_v37 = vsub.s32 2, %v1861_v48 }
  0xba   :  { %1442 = vmatprep.subr.bf16.mxu1 %v1677_v38  ;;  %v1663_v38 = vld [vmem:[#allocation4 + $0x1c0] ss:$8 sps:$4 sm:$0xff]  }
  0xbd   :  { %1443 = vmatpush3.bf16.msra.mxu1 %v1678_v39  ;;  %v166_v39 = vsub.s32 3, %v1861_v48 }
  0xbe   :  { %1444 = vmatprep.subr.bf16.mxu1 %v1679_v40  ;;  %v1668_v40 = vld [vmem:[#allocation4 + $0x1d4] ss:$8 sps:$4 sm:$0xff]  }
  0xc1   :  { %1445 = vmatpush3.bf16.msra.mxu1 %v1680_v41  ;;  %v163_v41 = vrot.slane %v1867_v50, %v162_v37 }
  0xc2   :  { %1446 = vmatprep.subr.bf16.mxu1 %v1681_v42  ;;  %v167_v42 = vrot.slane %v1867_v50, %v166_v39 }
  0xc5   :  { %1447 = vmatpush3.bf16.msra.mxu1 %v1682_v43  ;;  %v1666_v43 = vld [vmem:[#allocation4 + $0x1d0] ss:$8 sps:$4 sm:$0xff]  }
  0xc6   :  { %1448 = vmatprep.subr.bf16.mxu1 %v1683_v44  ;;  %v1671_v44 = vld [vmem:[#allocation4 + $0x1e4] ss:$8 sps:$4 sm:$0xff]  }
  0xc9   :  { %1449 = vmatpush3.bf16.msra.mxu1 %v1684_v46 }
 0x14b   :  { %v526_v54 = vpop.f32.mrb[0].mxu1 }
 0x14c   :  { %v527_v55 = vadd.f32 %v526_v54, %v155_v52  ;;  %v528_v56 = vpop.f32.mrb[1].mxu1 }
 0x14d   :  { %v529_v57 = vadd.f32 %v528_v56, %v159_v53  ;;  %v530_v58 = vpop.f32.mrb[2].mxu1  ;;  %v82_v56 = vunpack.c.l.bf16 %v1850_v13 }
 0x14e   :  { %v578_v61 = vmax.f32 %v527_v55, 0.0  ;;  %v531_v63 = vadd.f32 %v530_v58, %v155_v52  ;;  %v532_v0 = vpop.f32.mrb[3].mxu1  ;;  %v1669_v55 = vld [vmem:[#allocation4 + $0x1e0] ss:$8 sps:$4 sm:$0xff]   ;;  %v85_v58 = vunpack.c.h.bf16 %v1850_v13 }
 0x14f   :  { %v579_v1 = vmax.f32 %v529_v57, 0.0  ;;  %v533_v2 = vadd.f32 %v532_v0, %v159_v53 }
 0x150   :  { %v582_v5 = vmax.f32 %v531_v63, 0.0  ;;  %v1883_v7 = vadd.f32 %v578_v61, %v1876_v60  ;;  %v1674_v63 = vld [vmem:[#allocation4 + $0x1f4] ss:$8 sps:$4 sm:$0xff]  }
 0x151   :  { %v583_v6 = vmax.f32 %v533_v2, 0.0  ;;  %v1888_v9 = vadd.f32 %v579_v1, %v81_v3 }
 0x152   :  { %v1886_v8 = vadd.f32 %v582_v5, %v1878_v62 }
 0x153   :  { %v1890_v10 = vadd.f32 %v583_v6, %v84_v4  ;;  %v1672_v4 = vld [vmem:[#allocation4 + $0x1f0] ss:$8 sps:$4 sm:$0xff]  }
 0x154   :  { %v594_v14 = vpack.c.bf16 %v1886_v8, %v1883_v7 }
 0x155   :  { %v595_v11 = vpack.c.bf16 %v1890_v10, %v1888_v9 }
 0x157   :  { %1026 = vmatprep.mubr.bf16.mxu0 %v595_v11 }
 0x158   :  { %1027 = vmatmul.mubr.bf16.vlgmr.msra.gmra.mrb[0].mxu0 %v594_v14  ;;  %v1685_v14 = vld [vmem:[#allocation6 + $0x68] sm:$0xff]  }
 0x159   :  { %1038 = vmatpush1.bf16.msra.mxu0 %v1627_v12  ;;  %1450 = vmatprep.subr.bf16.mxu1 %v1685_v14 }
 0x15a   :  { %1039 = vmatprep.subr.bf16.mxu0 %v1632_v45  ;;  %v1686_v45 = vld [vmem:[#allocation6 + $0x28] sm:$0xff]  }
 0x15b   :  { %1451 = vmatpush3.bf16.msra.mxu1 %v1686_v45 }
 0x15d   :  { %1040 = vmatpush1.bf16.msra.mxu0 %v1630_v15  ;;  %v1687_v15 = vld [vmem:[#allocation6 + $0x70] sm:$0xff]  }
 0x15e   :  { %1041 = vmatprep.subr.bf16.mxu0 %v1635_v16  ;;  %v1688_v16 = vld [vmem:[#allocation6 + $0x30] sm:$0xff]   ;;  %1452 = vmatprep.subr.bf16.mxu1 %v1687_v15 }
 0x15f   :  { %1453 = vmatpush3.bf16.msra.mxu1 %v1688_v16 }
 0x161   :  { %1042 = vmatpush1.bf16.msra.mxu0 %v1633_v17  ;;  %v1690_v17 = vld [vmem:[#allocation6 + $0x38] sm:$0xff]  }
 0x162   :  { %1043 = vmatprep.subr.bf16.mxu0 %v1638_v18 }
 0x165   :  { %1044 = vmatpush1.bf16.msra.mxu0 %v1636_v19 }
 0x166   :  { %1045 = vmatprep.subr.bf16.mxu0 %v1641_v20 }
 0x169   :  { %1046 = vmatpush1.bf16.msra.mxu0 %v1639_v21 }
 0x16a   :  { %1047 = vmatprep.subr.bf16.mxu0 %v1644_v22 }
 0x16d   :  { %1048 = vmatpush1.bf16.msra.mxu0 %v1642_v23 }
 0x16e   :  { %1049 = vmatprep.subr.bf16.mxu0 %v1647_v24 }
 0x171   :  { %1050 = vmatpush1.bf16.msra.mxu0 %v1645_v25 }
 0x172   :  { %1051 = vmatprep.subr.bf16.mxu0 %v1650_v26 }
 0x175   :  { %1052 = vmatpush1.bf16.msra.mxu0 %v1648_v27 }
 0x176   :  { %1053 = vmatprep.subr.bf16.mxu0 %v1653_v28 }
 0x179   :  { %1054 = vmatpush1.bf16.msra.mxu0 %v1651_v29 }
 0x17a   :  { %1055 = vmatprep.subr.bf16.mxu0 %v1656_v30 }
 0x17d   :  { %1056 = vmatpush1.bf16.msra.mxu0 %v1654_v31 }
 0x17e   :  { %1057 = vmatprep.subr.bf16.mxu0 %v1659_v32 }
 0x181   :  { %1058 = vmatpush1.bf16.msra.mxu0 %v1657_v33 }
 0x182   :  { %1059 = vmatprep.subr.bf16.mxu0 %v1662_v34 }
 0x185   :  { %1060 = vmatpush1.bf16.msra.mxu0 %v1660_v35 }
 0x186   :  { %1061 = vmatprep.subr.bf16.mxu0 %v1665_v36  ;;  %v1414_v36 = vld [vmem:[%s1927_s6] ss:$0 sm:$0xff] }
 0x189   :  { %1062 = vmatpush1.bf16.msra.mxu0 %v1663_v38 }
 0x18a   :  { %1063 = vmatprep.subr.bf16.mxu0 %v1668_v40 }
 0x18b   :  { %v569_v46 = vpop.f32.mrb[4].mxu1 }
 0x18c   :  { %v570_v47 = vadd.f32 %v569_v46, %v163_v41  ;;  %v571_v52 = vpop.f32.mrb[5].mxu1 }
 0x18d   :  { %v572_v53 = vadd.f32 %v571_v52, %v167_v42  ;;  %v573_v54 = vpop.f32.mrb[6].mxu1  ;;  %1064 = vmatpush1.bf16.msra.mxu0 %v1666_v43 }
 0x18e   :  { %v580_v57 = vmax.f32 %v570_v47, 0.0  ;;  %v574_v59 = vadd.f32 %v573_v54, %v163_v41  ;;  %v575_v61 = vpop.f32.mrb[7].mxu1  ;;  %1065 = vmatprep.subr.bf16.mxu0 %v1671_v44 }
 0x18f   :  { %v581_v50 = vmax.f32 %v572_v53, 0.0  ;;  %v576_v0 = vadd.f32 %v575_v61, %v167_v42 }
 0x190   :  { %v584_v1 = vmax.f32 %v574_v59, 0.0  ;;  %v588_v5 = vadd.f32 %v580_v57, %v82_v56 }
 0x191   :  { %v589_v2 = vadd.f32 %v581_v50, %v1876_v60  ;;  %v585_v3 = vmax.f32 %v576_v0, 0.0  ;;  %1066 = vmatpush1.bf16.msra.mxu0 %v1669_v55  ;;  %v1689_v60 = vld [vmem:[#allocation6 + $0x78] sm:$0xff]  }
 0x192   :  { %v592_v6 = vadd.f32 %v584_v1, %v85_v58  ;;  %1067 = vmatprep.subr.bf16.mxu0 %v1674_v63  ;;  %1454 = vmatprep.subr.bf16.mxu1 %v1689_v60 }
 0x193   :  { %v593_v11 = vadd.f32 %v585_v3, %v1878_v62  ;;  %1455 = vmatpush3.bf16.msra.mxu1 %v1690_v17  ;;  %v662_v62 = vld [vmem:[%s1925_s4] sm:$0x3] }
 0x194   :  { %v596_v12 = vpack.c.bf16 %v592_v6, %v588_v5  ;;  %v667_v18 = vrot.slane %v662_v62, %v154_v49  ;;  %v671_v19 = vrot.slane %v662_v62, %v158_v51 }
 0x195   :  { %1068 = vmatpush1.bf16.msra.mxu0 %v1672_v4  ;;  %v597_v13 = vpack.c.bf16 %v593_v11, %v589_v2 }
 0x197   :  { %1069 = vmatprep.mubr.bf16.mxu0 %v597_v13 }
 0x198   :  { %1070 = vmatmul.mubr.bf16.vlgmr.msra.gmra.mrb[0].mxu0 %v596_v12 }
 0x26b   :  { %v1071_v20 = vpop.f32.mrb[0].mxu0 }
 0x26c   :  { %v1462_v21 = vadd.f32 %v1071_v20, %v667_v18  ;;  %v1073_v22 = vpop.f32.mrb[1].mxu0 }
 0x26d   :  { %v1463_v23 = vadd.f32 %v1073_v22, %v671_v19  ;;  %v1075_v24 = vpop.f32.mrb[2].mxu0 }
 0x26e   :  { %v1464_v25 = vadd.f32 %v1075_v24, %v667_v18  ;;  %v1077_v26 = vpop.f32.mrb[3].mxu0  ;;  %v1080_v29 = vmax.f32 %v1462_v21, 0.0 }
 0x26f   :  { %v1081_v27 = vmax.f32 %v1463_v23, 0.0  ;;  %v1465_v28 = vadd.f32 %v1077_v26, %v671_v19 }
 0x270   :  { %v1082_v30 = vmax.f32 %v1464_v25, 0.0  ;;  %v1084_v48 = vadd.f32 %v1080_v29, %v1883_v7 }
 0x271   :  { %v1083_v31 = vmax.f32 %v1465_v28, 0.0  ;;  %v1085_v33 = vadd.f32 %v1081_v27, %v1888_v9 }
 0x272   :  { %v1086_v32 = vadd.f32 %v1082_v30, %v1886_v8 }
 0x273   :  { %v1087_v49 = vadd.f32 %v1083_v31, %v1890_v10 }
 0x274   :  { %v1088_v34 = vpack.c.bf16 %v1086_v32, %v1084_v48 }
 0x275   :  { %v1089_v51 = vpack.c.bf16 %v1087_v49, %v1085_v33 }
 0x277   :  { %1257 = vmatprep.mubr.bf16.mxu1 %v1089_v51 }
 0x278   :  { %1258 = vmatmul.mubr.bf16.vlgmr.msra.gmra.mrb[8].mxu1 %v1088_v34 }
 0x34b   :  { %v1456_v35 = vpop.f32.mrb[8].mxu1 }
 0x34c   :  { %v1457_v37 = vpop.f32.mrb[9].mxu1 }
 0x34d   :  { %v1458_v38 = vadd.f32 %v1457_v37, %v1456_v35  ;;  %v1459_v39 = vpop.f32.mrb[10].mxu1 }
 0x34e   :  { %v1460_v40 = vpop.f32.mrb[11].mxu1 }
 0x34f   :  { %v1260_v8 = vadd.f32 %v1458_v38, %v1414_v36  ;;  %v1461_v41 = vadd.f32 %v1460_v40, %v1459_v39 }
 0x351   :  { %v1263_v9 = vadd.f32 %v1461_v41, %v1414_v36  ;;  %v1266_v42 = vadd.f32 %v1260_v8, %v1084_v48 }
 0x353   :  { %v1267_v10 = vadd.f32 %v1263_v9, %v1086_v32 }
 0x355   :  { %v1438_v43 = vpack.c.bf16 %v1267_v10, %v1266_v42 }
 0x357   :  { %1439 = vst [vmem:[%s1928_s7] sm:$0xff] %v1438_v43  }
 0x358   :  { %1282 = vsyncpa [#allocation3], 1 }
 0x359   :  { %1283 = vsyncpa [#allocation5], 1 }

</bundles_post_ra>
